<compile_context>
chip_gen: v7x
topology: tpu7x:2x2x1
jax: 0.10.0
libtpu: 0.0.40
codegen_flags: <defaults>
</compile_context>

<pallas_src>
import math
from functools import partial
from itertools import permutations

import jax
import jax.numpy as jnp
from jax.experimental import pallas as pl
from jax.experimental.pallas import tpu as pltpu

EPS = 1e-8
_INV_LN10 = 1.0 / math.log(10.0)


def _round_up(x, m):
    return (x + m - 1) // m * m


def _num_tensorcores():
    """Best-effort count of TensorCores one Pallas program can shard over."""
    try:
        kind = jax.devices()[0].device_kind.lower()
    except Exception:
        return 1
    for tag in ("v4", "v5p", "v7", "7x"):
        if tag in kind:
            return 2
    return 1


# --------------------------------------------------------------------------- #
# Pallas kernel: streaming Gram accumulation over the time axis.
#
#   X = [ est rows (h) | gap | tgt rows (h) | gap | ones rows ]   (R, tt)
#   acc += X @ X^T   (f32 accumulation on the MXU)
#
# After the last time step the accumulated Gram of one batch block holds every
# quantity SI-SDR needs:  <est_i, tgt_j>, ||est_i||^2, ||tgt_j||^2 and (via the
# ones row) per-source sums — nothing else runs per step.
# --------------------------------------------------------------------------- #
def _gram_kernel(est_ref, tgt_ref, out_ref, x_ref, acc_ref, *, h, t_off):
    t = pl.program_id(1)

    @pl.when(t == 0)
    def _init():
        acc_ref[...] = jnp.zeros_like(acc_ref)
        r_tot, cols = x_ref.shape
        # Zero once (covers the alignment-gap rows), then set the constant
        # ones rows (row 2*t_off is the one read later for per-row sums).
        x_ref[...] = jnp.zeros((r_tot, cols), x_ref.dtype)
        x_ref[2 * t_off:, :] = jnp.ones((r_tot - 2 * t_off, cols), x_ref.dtype)

    # Stack [est ; tgt] into the Gram operand: plain dense 2-D copies at
    # sublane-aligned offsets, no dtype cast (bf16 feeds the MXU directly).
    x_ref[:h, :] = est_ref[...]
    x_ref[t_off:t_off + h, :] = tgt_ref[...]

    x = x_ref[...]
    acc_ref[...] += jax.lax.dot_general(
        x, x,
        dimension_numbers=(((1,), (1,)), ((), ())),   # X @ X^T
        preferred_element_type=jnp.float32)

    @pl.when(t == pl.num_programs(1) - 1)
    def _done():
        out_ref[0, :, :] = acc_ref[...]


# --------------------------------------------------------------------------- #
# Tiling plan: dense-sublane batch blocks + VMEM-budgeted time tiles.
# --------------------------------------------------------------------------- #
def _plan_tiles(B, n, T, dtype, *, block_bytes_budget, max_time_tile,
                vmem_target_bytes):
    itemsize = jnp.dtype(dtype).itemsize
    row_gran = max(8, 32 // itemsize)          # dense sublane rows per vreg group
    num_tc = _num_tensorcores()

    # ---- batch tile: bb batches per block, h = bb*n rows ----
    best_key, bb = None, B
    for cand in range(1, B + 1):
        if B % cand:
            continue
        rows = cand * n
        if rows % 8 and cand != B:             # BlockSpec sublane constraint
            continue
        nblocks = B // cand
        if nblocks >= num_tc and nblocks % num_tc == 0:
            tc_score = 2                       # every TensorCore evenly loaded
        elif nblocks >= num_tc:
            tc_score = 1
        else:
            tc_score = 0
        key = (tc_score, rows <= 256, rows % row_gran == 0, cand)
        if best_key is None or key > best_key:
            best_key, bb = key, cand

    h = bb * n                                  # rows per half (est or tgt)
    h_off = _round_up(h, row_gran)              # aligned tgt-row offset
    R = _round_up(2 * h_off + 1, row_gran)      # stacked operand height (+ones)

    # ---- time tile: multiple of 128, sized by the per-input VMEM budget ----
    t128 = _round_up(max(T, 1), 128)
    max_tt = max(128, (max_time_tile // 128) * 128)
    tt = max(128, (block_bytes_budget // (h_off * itemsize)) // 128 * 128)
    tt = min(tt, max_tt, t128)

    def vmem_needed(tt_):
        lane_r = _round_up(R, 128)
        in_bytes = 2 * 2 * h_off * tt_ * itemsize     # 2 inputs x 2 buffers
        x_bytes = R * tt_ * itemsize                  # stacked Gram operand
        acc_bytes = R * lane_r * 4                    # f32 Gram scratch
        out_bytes = 2 * R * lane_r * 4                # output block buffers
        return in_bytes + x_bytes + acc_bytes + out_bytes

    while vmem_needed(tt) > vmem_target_bytes and tt > 128:
        tt = max(128, (tt // 2 // 128) * 128)

    vmem_limit = int(min(max(vmem_needed(tt) * 5 // 4 + (4 << 20), 32 << 20),
                         56 << 20))                    # stay inside v7x's 64 MiB
    return bb, h, h_off, R, tt, vmem_limit


def _gram_pallas(est2, tgt2, *, bb, h, h_off, R, tt, T_padded, vmem_limit):
    nb = est2.shape[0] // h
    grid = (nb, T_padded // tt)
    return pl.pallas_call(
        partial(_gram_kernel, h=h, t_off=h_off),
        out_shape=jax.ShapeDtypeStruct((nb, R, R), jnp.float32),
        grid_spec=pltpu.PrefetchScalarGridSpec(
            num_scalar_prefetch=0,
            grid=grid,
            in_specs=[
                pl.BlockSpec((h, tt), lambda b, t: (b, t)),
                pl.BlockSpec((h, tt), lambda b, t: (b, t)),
            ],
            out_specs=pl.BlockSpec((1, R, R), lambda b, t: (b, 0, 0)),
            scratch_shapes=[
                pltpu.VMEM((R, tt), est2.dtype),       # stacked [est;tgt;ones]
                pltpu.VMEM((R, R), jnp.float32),       # f32 Gram accumulator
            ],
        ),
        compiler_params=pltpu.CompilerParams(
            dimension_semantics=("parallel", "arbitrary"),
            vmem_limit_bytes=vmem_limit,
        ),
    )(est2, tgt2)


# --------------------------------------------------------------------------- #
# pairwise_neg_sisdr equivalent: Pallas Gram kernel + tiny plain-JAX epilogue.
# --------------------------------------------------------------------------- #
def pairwise_neg_sisdr_pallas(est_targets, targets, *,
                              block_bytes_budget=6 * 1024 * 1024,
                              max_time_tile=1 << 20,
                              vmem_target_bytes=40 * 1024 * 1024):
    """Pairwise neg SI-SDR matrix of shape (batch, n_src_est, n_src_tgt)."""
    assert est_targets.shape == targets.shape
    B, n, T = targets.shape
    dtype = targets.dtype

    bb, h, h_off, R, tt, vmem_limit = _plan_tiles(
        B, n, T, dtype, block_bytes_budget=block_bytes_budget,
        max_time_tile=max_time_tile, vmem_target_bytes=vmem_target_bytes)

    # 2-D (B*n_src, T) layout: dense sublanes, reshape of contiguous data.
    est2 = est_targets.reshape(B * n, T)
    tgt2 = targets.reshape(B * n, T)
    Tp = _round_up(T, tt)
    if Tp != T:
        # Zero padding is exact for dot / sum / sum-of-squares and keeps the
        # streaming pipeline from ever relying on OOB block reads.
        pad = ((0, 0), (0, Tp - T))
        est2 = jnp.pad(est2, pad)
        tgt2 = jnp.pad(tgt2, pad)

    gram = _gram_pallas(est2, tgt2, bb=bb, h=h, h_off=h_off, R=R, tt=tt,
                        T_padded=Tp, vmem_limit=vmem_limit)

    # ---- tiny O(B*n^2) epilogue in plain JAX (exact f32 division) ----
    nb = B // bb
    cross = gram[:, :h, h_off:h_off + h].reshape(nb, bb, n, bb, n)
    dot = jnp.einsum("abicj,bc->abij", cross,
                     jnp.eye(bb, dtype=jnp.float32)).reshape(B, n, n)
    est_sq = jnp.diagonal(gram[:, :h, :h], axis1=1, axis2=2).reshape(B, n)
    tgt_sq = jnp.diagonal(gram[:, h_off:h_off + h, h_off:h_off + h],
                          axis1=1, axis2=2).reshape(B, n)
    sums = gram[:, 2 * h_off, :]
    est_sum = sums[:, :h].reshape(B, n)
    tgt_sum = sums[:, h_off:h_off + h].reshape(B, n)

    inv_T = jnp.float32(1.0 / T)
    # Zero-mean step folded in algebraically:
    #   <x-mx, y-my> = <x,y> - sum(x)sum(y)/T ; ||x-mx||^2 = ||x||^2 - sum(x)^2/T
    dot_zm = dot - (est_sum[:, :, None] * tgt_sum[:, None, :]) * inv_T
    est_e = est_sq - est_sum * est_sum * inv_T
    tgt_e = tgt_sq - tgt_sum * tgt_sum * inv_T

    te = tgt_e + EPS                               # asteroid adds EPS here
    alpha = dot_zm / te[:, None, :]                # projection coefficient
    proj_e = alpha * alpha * tgt_e[:, None, :]     # ||proj||^2
    noise_e = est_e[:, :, None] - 2.0 * alpha * dot_zm + proj_e
    # TODO(synk): the algebraic ||est - proj||^2 loses precision (catastrophic
    # cancellation) when est ~= alpha*tgt; matching asteroid's time-domain
    # subtraction exactly would require materializing the residual signal.
    noise_e = jnp.maximum(noise_e, 0.0)
    sdr = proj_e / (noise_e + EPS)
    return (-10.0 * _INV_LN10) * jnp.log(sdr + EPS)   # -10 * log10(.)


# --------------------------------------------------------------------------- #
# PITLossWrapper.forward equivalent (pit_from='pw_mtx', perm_reduce=None).
# --------------------------------------------------------------------------- #
def pit_loss_wrapper_forward(est_targets, targets, return_est=False,
                             **pallas_kwargs):
    B, n_src, _ = targets.shape
    assert n_src < 10, f"Expected source axis along dim 1, found {n_src}"

    pw_losses = pairwise_neg_sisdr_pallas(est_targets, targets, **pallas_kwargs)

    # find_best_perm_factorial (perm_reduce=None path):
    #   loss_set[b, p] = mean_i pw_losses[b, perms[p, i], i]
    # TODO(synk): asteroid switches to scipy's Hungarian solver for n_src > 3;
    # the exhaustive factorial search below yields the same argmin in-graph.
    perms = jnp.asarray(list(permutations(range(n_src))), dtype=jnp.int32)
    loss_set = jnp.mean(pw_losses[:, perms, jnp.arange(n_src)], axis=-1)

    min_loss = jnp.min(loss_set, axis=1)
    min_loss_idx = jnp.argmin(loss_set, axis=1)
    batch_indices = perms[min_loss_idx]
    mean_loss = jnp.mean(min_loss)

    if not return_est:
        return mean_loss
    reordered = jnp.take_along_axis(est_targets, batch_indices[:, :, None], axis=1)
    return mean_loss, reordered


# ------------------- pure-JAX reference (silent sanity check) ------------------- #
def _reference_forward(est_targets, targets):
    est = est_targets.astype(jnp.float32)
    tgt = targets.astype(jnp.float32)
    est = est - jnp.mean(est, axis=-1, keepdims=True)
    tgt = tgt - jnp.mean(tgt, axis=-1, keepdims=True)
    s_est = est[:, :, None, :]
    s_tgt = tgt[:, None, :, :]
    dot = jnp.sum(s_est * s_tgt, axis=-1, keepdims=True)
    te = jnp.sum(s_tgt * s_tgt, axis=-1, keepdims=True) + EPS
    proj = dot * s_tgt / te
    noise = s_est - proj
    sdr = jnp.sum(proj ** 2, -1) / (jnp.sum(noise ** 2, -1) + EPS)
    pw = -10.0 * jnp.log(sdr + EPS) * _INV_LN10
    n_src = targets.shape[1]
    perms = jnp.asarray(list(permutations(range(n_src))), dtype=jnp.int32)
    loss_set = jnp.mean(pw[:, perms, jnp.arange(n_src)], axis=-1)
    return jnp.mean(jnp.min(loss_set, axis=1))


if __name__ == "__main__":
    key = jax.random.PRNGKey(0)
    k1, k2 = jax.random.split(key)
    B, n_src, T = 4, 3, 1024
    est_targets = jax.random.normal(k1, (B, n_src, T), dtype=jnp.float32)
    targets = jax.random.normal(k2, (B, n_src, T), dtype=jnp.float32)

    # max_time_tile=256 forces several time blocks so the streaming Gram
    # accumulation path is exercised even at this small demo length.
    mean_loss, reordered = pit_loss_wrapper_forward(
        est_targets, targets, return_est=True, max_time_tile=256)
    mean_loss = jax.block_until_ready(mean_loss)
    reordered = jax.block_until_ready(reordered)

    ref = jax.block_until_ready(_reference_forward(est_targets, targets))
    assert reordered.shape == est_targets.shape
    assert jnp.allclose(mean_loss, ref, rtol=1e-2, atol=1e-2), (mean_loss, ref)

    print("KERNEL_OK")
</pallas_src>

<mosaic_0001>
module attributes {stable_mosaic.version = 11 : i64} {
  func.func @_gram_kernel(%arg0: i32, %arg1: i32, %arg2: memref<12x256xf32, #tpu.memory_space<vmem>>, %arg3: memref<12x256xf32, #tpu.memory_space<vmem>>, %arg4: memref<1x40x40xf32, #tpu.memory_space<vmem>>, %arg5: memref<40x256xf32, #tpu.memory_space<vmem>>, %arg6: memref<40x40xf32, #tpu.memory_space<vmem>>) attributes {dimension_semantics = [#tpu.dimension_semantics<parallel>, #tpu.dimension_semantics<arbitrary>], iteration_bounds = array<i64: 1, 4>, scalar_prefetch = 0 : i64, scratch_operands = 2 : i64, tpu.core_type = #tpu.core_type<tc>, window_params = [{transform_indices = @transform_0, window_bounds = array<i64: 12, 256>}, {transform_indices = @transform_1, window_bounds = array<i64: 12, 256>}, {transform_indices = @transform_2, window_bounds = array<i64: 1, 40, 40>}]} {
    %c0_i32 = arith.constant 0 : i32
    %0 = arith.cmpi eq, %arg1, %c0_i32 : i32
    %1 = arith.extui %0 : i1 to i32
    %c0_i32_0 = arith.constant 0 : i32
    %2 = arith.cmpi ne, %1, %c0_i32_0 : i32
    scf.if %2 {
      %cst_14 = arith.constant 0.000000e+00 : f32
      %15 = vector.broadcast %cst_14 : f32 to vector<40x40xf32>
      %c0_15 = arith.constant 0 : index
      %c0_16 = arith.constant 0 : index
      %16 = vector.load %arg6[%c0_15, %c0_16] : memref<40x40xf32, #tpu.memory_space<vmem>>, vector<40x40xf32>
      tpu.vector_store %arg6[%c0_15, %c0_16], %15 {strides = array<i32>} : memref<40x40xf32, #tpu.memory_space<vmem>>, vector<40x40xf32>,
      %cst_17 = arith.constant 0.000000e+00 : f32
      %17 = vector.broadcast %cst_17 : f32 to vector<40x256xf32>
      %c0_18 = arith.constant 0 : index
      %c0_19 = arith.constant 0 : index
      %18 = vector.load %arg5[%c0_18, %c0_19] : memref<40x256xf32, #tpu.memory_space<vmem>>, vector<40x256xf32>
      tpu.vector_store %arg5[%c0_18, %c0_19], %17 {strides = array<i32>} : memref<40x256xf32, #tpu.memory_space<vmem>>, vector<40x256xf32>,
      %cst_20 = arith.constant 1.000000e+00 : f32
      %19 = vector.broadcast %cst_20 : f32 to vector<8x256xf32>
      %c32 = arith.constant 32 : index
      %c0_21 = arith.constant 0 : index
      %20 = vector.load %arg5[%c32, %c0_21] : memref<40x256xf32, #tpu.memory_space<vmem>>, vector<8x256xf32>
      tpu.vector_store %arg5[%c32, %c0_21], %19 {strides = array<i32>} : memref<40x256xf32, #tpu.memory_space<vmem>>, vector<8x256xf32>,
    } else {
    }
    %c0 = arith.constant 0 : index
    %c0_1 = arith.constant 0 : index
    %3 = vector.load %arg2[%c0, %c0_1] : memref<12x256xf32, #tpu.memory_space<vmem>>, vector<12x256xf32>
    %c0_2 = arith.constant 0 : index
    %c0_3 = arith.constant 0 : index
    %4 = vector.load %arg5[%c0_2, %c0_3] : memref<40x256xf32, #tpu.memory_space<vmem>>, vector<12x256xf32>
    tpu.vector_store %arg5[%c0_2, %c0_3], %3 {strides = array<i32>} : memref<40x256xf32, #tpu.memory_space<vmem>>, vector<12x256xf32>,
    %c0_4 = arith.constant 0 : index
    %c0_5 = arith.constant 0 : index
    %5 = vector.load %arg3[%c0_4, %c0_5] : memref<12x256xf32, #tpu.memory_space<vmem>>, vector<12x256xf32>
    %c16 = arith.constant 16 : index
    %c0_6 = arith.constant 0 : index
    %6 = vector.load %arg5[%c16, %c0_6] : memref<40x256xf32, #tpu.memory_space<vmem>>, vector<12x256xf32>
    tpu.vector_store %arg5[%c16, %c0_6], %5 {strides = array<i32>} : memref<40x256xf32, #tpu.memory_space<vmem>>, vector<12x256xf32>,
    %c0_7 = arith.constant 0 : index
    %c0_8 = arith.constant 0 : index
    %7 = vector.load %arg5[%c0_7, %c0_8] : memref<40x256xf32, #tpu.memory_space<vmem>>, vector<40x256xf32>
    %c0_9 = arith.constant 0 : index
    %c0_10 = arith.constant 0 : index
    %8 = vector.load %arg6[%c0_9, %c0_10] : memref<40x40xf32, #tpu.memory_space<vmem>>, vector<40x40xf32>
    %cst = arith.constant dense<0.000000e+00> : vector<40x40xf32>
    %9 = tpu.matmul %7, %7, %cst {dimension_numbers = #tpu.dot_dimension_numbers<[1], [1], [0], [0], [0, 0, 1, 0], [], []>} : vector<40x256xf32>, vector<40x256xf32>, vector<40x40xf32> -> vector<40x40xf32>
    %10 = arith.addf %8, %9 : vector<40x40xf32>
    %c0_11 = arith.constant 0 : index
    %c0_12 = arith.constant 0 : index
    %11 = vector.load %arg6[%c0_11, %c0_12] : memref<40x40xf32, #tpu.memory_space<vmem>>, vector<40x40xf32>
    tpu.vector_store %arg6[%c0_11, %c0_12], %10 {strides = array<i32>} : memref<40x40xf32, #tpu.memory_space<vmem>>, vector<40x40xf32>,
    %c3_i32 = arith.constant 3 : i32
    %12 = arith.cmpi eq, %arg1, %c3_i32 : i32
    %13 = arith.extui %12 : i1 to i32
    %c0_i32_13 = arith.constant 0 : i32
    %14 = arith.cmpi ne, %13, %c0_i32_13 : i32
    scf.if %14 {
      %c0_14 = arith.constant 0 : index
      %c0_15 = arith.constant 0 : index
      %15 = vector.load %arg6[%c0_14, %c0_15] : memref<40x40xf32, #tpu.memory_space<vmem>>, vector<40x40xf32>
      %c0_16 = arith.constant 0 : index
      %c0_17 = arith.constant 0 : index
      %c0_18 = arith.constant 0 : index
      %16 = vector.load %arg4[%c0_16, %c0_17, %c0_18] : memref<1x40x40xf32, #tpu.memory_space<vmem>>, vector<1x40x40xf32>
      %17 = vector.shape_cast %16 : vector<1x40x40xf32> to vector<40x40xf32>
      %18 = vector.shape_cast %15 : vector<40x40xf32> to vector<1x40x40xf32>
      tpu.vector_store %arg4[%c0_16, %c0_17, %c0_18], %18 {strides = array<i32>} : memref<1x40x40xf32, #tpu.memory_space<vmem>>, vector<1x40x40xf32>,
    } else {
    }
    return
  }
  func.func @transform_0(%arg0: i32, %arg1: i32) -> (i32, i32) {
    %c0_i32 = arith.constant 0 : i32
    return %arg0, %arg1 : i32, i32
  }
  func.func @transform_1(%arg0: i32, %arg1: i32) -> (i32, i32) {
    %c0_i32 = arith.constant 0 : i32
    return %arg0, %arg1 : i32, i32
  }
  func.func @transform_2(%arg0: i32, %arg1: i32) -> (i32, i32, i32) {
    %c0_i32 = arith.constant 0 : i32
    %c0_i32_0 = arith.constant 0 : i32
    %c0_i32_1 = arith.constant 0 : i32
    return %arg0, %c0_i32, %c0_i32_0 : i32, i32, i32
  }
}

</mosaic_0001>

<bundles_post_ra>
// kernel: tpu_custom_call.1
= control target key start
LH: loop header
LB: loop body
LE: loop exit
PB: predicated region body
PF: predicated region fallthrough
CT: control target
= control target key end

     0   :  { %7 = vsyncpa [#allocation5], 0  ;;  %s999_s0 = inlined_call_operand.hbm [shape: f32[12,1024], index: 0, kind: input, shape index: {}]   ;;  %s1000_s1 = inlined_call_operand.hbm [shape: f32[12,1024], index: 1, kind: input, shape index: {}]   ;;  %s1001_s2 = inlined_call_operand.hbm [shape: f32[1,40,40], index: 2, kind: output, shape index: {}]  }
   0x1   :  { %9 = vsyncpa [#allocation5 + $0x1], 0 }
   0x2   :  { %10 = vsyncpa [#allocation8], 0 }
   0x3   :  { %12 = vsyncpa [#allocation8 + $0x1], 0 }
   0x4   :  { %13 = vsyncpa [#allocation6], 0  ;;  %s770_s9 = smov 0   ;;  %s772_s10 = smov 0  }
   0x5   :  { %s774_s11 = smov 0   ;;  %s776_s12 = smov 0  }
   0x6   :  { %s778_s13 = smov 0   ;;  %s780_s14 = smov 0  }
   0x7 LB: > { %s491_s15 = sadd.s32 4294967295, %s743_s14   ;;  %s28_s16 = sadd.s32 1, %s739_s13  ;;  %s743_s14 = sphi %s780_s14, %s19_s14   ;;  %s739_s13 = sphi %s778_s13, %s1014_s13   ;;  %s735_s12 = sphi %s776_s12, %s1013_s12   ;;  %s731_s11 = sphi %s774_s11, %s1012_s11   ;;  %s727_s10 = sphi %s772_s10, %s1011_s10   ;;  %s723_s9 = sphi %s770_s9, %s1010_s9  }
   0x8   : > { %p29_p0 = scmp.ge.s32.totalorder %s28_s16, 4  ;;  %s40_s17 = sadd.s32 1, %s731_s11 }
   0x9   : > { %p47_p1 = scmp.ne.s32.totalorder %s731_s11, %s727_s10  ;;  %p48_p2 = scmp.eq.s32.totalorder %s743_s14, 0 }
   0xa   : > { %s1016_s16 = smov (%p29_p0, %s28_s16), 0  ;;  %p53_p4 = scmp.ne.s32.totalorder %s727_s10, %s723_s9 }
   0xb   : > { %p806_p3 = por %p48_p2, %p47_p1  ;;  %s36_s19 = ssub.s32 %s739_s13, %s1016_s16 }
   0xc   : > { %p54_p5 = scmp.eq.s32.totalorder %s491_s15, 0  ;;  %p38_p6 = scmp.eq.s32.totalorder %s36_s19, 0 }
   0xd   : > { %p540_p8 = scmp.lt.s32.totalorder %s743_s14, 4  ;;  %s824_s22 = sand.u32 1, %s731_s11  }
   0xe   : > { %p815_p7 = por %p54_p5, %p53_p4  ;;  %s509_s23 = sshll.u32 %s739_s13, 8 }
   0xf   : > { %s821_s21 = scalar_select %p38_p6, %s731_s11, %s40_s17  }
  0x10   : > { %s1004_s20 = scalar_select %p815_p7, 1, 0 }
  0x11   : > { %s494_s24 = sshll.u32 %s824_s22, 5  ;;  %s833_s27 = scalar_lea.hbm %s999_s0, %s509_s23 }
  0x12   : > { %s135_s28 = scalar_lea.vmem [#allocation4], %s494_s24  ;;  %p839_p9 = pnand %p540_p8, %p806_p3 }
  0x13   : > { %s145_s29 = sshll.u32 %s135_s28, 4  ;;  %s132_s3 = scalar_lea.sflag [#allocation5], %s824_s22  ;;  %s843_s29 = int_to_ptr.vmem [resolvable:$true] %s145_s29 }
  0x14   : > { %s599_s4 = scalar_lea.hbm %s833_s27, 512  ;;  %p601_p12 = pneg %p839_p9 }
  0x15   : > { %p600_p11 = scmp.ne.s32.totalorder %s833_s27, %s599_s4  ;;  %s604_s7 = scalar_lea.hbm %s999_s0, 2048 }
  0x16   : > { %p605_p1 = scmp.lt.u32.totalorder %s833_s27, %s999_s0  ;;  %p606_p2 = scmp.lt.u32.totalorder %s604_s7, %s599_s4 }
  0x17   : > { %p602_p13 = pnand %p601_p12, %p600_p11  ;;  %p608_p4 = scmp.lt.u32.totalorder %s599_s4, %s833_s27 }
  0x18   : > { %p607_p3 = por %p606_p2, %p605_p1 }
  0x19   : > { %p603_p0 = pneg %p602_p13 }
  0x1a   : > { %p609_p5 = por %p608_p4, %p607_p3 }
  0x1c   : > { %p610_p6 = pnand %p609_p5, %p603_p0 }
  0x1e   : > { %613 = shalt.err (!%p610_p6)
}
  0x1f   : > { %s614_s17 = scalar_lea.vmem %s843_s29, 512  ;;  %s745_s18 = smov [#allocation4]  }
  0x20   : > { %p615_p8 = scmp.ne.s32.totalorder %s843_s29, %s614_s17  ;;  %s619_s19 = sshll.u32 %s745_s18, 4  ;;  %s620_s19 = int_to_ptr.vmem [resolvable:$false] %s619_s19 }
  0x21   : > { %s621_s25 = scalar_lea.vmem %s620_s19, 1024  ;;  %p622_p10 = scmp.lt.s32.totalorder %s843_s29, %s620_s19 }
  0x22   : > { %p617_p11 = pnand %p615_p8, %p601_p12  ;;  %p623_p1 = scmp.lt.s32.totalorder %s621_s25, %s614_s17 }
  0x24   : > { %p618_p13 = pneg %p617_p11  ;;  %p624_p2 = por %p623_p1, %p622_p10 }
  0x26   : > { %p625_p3 = pnand %p624_p2, %p618_p13 }
  0x28   : > { %628 = shalt.err (!%p625_p3)
}
  0x29   : > { %s746_s26 = smov 1024   ;;  %s747_s28 = smov 256  }
  0x2a   : > { %s748_s4 = smov 16   ;;  %p177_p10 = scmp.lt.s32.totalorder %s743_s14, 5 }
  0x2b   : > { %536 = dma.hbm_to_vmem [thread:$0]  (!%p839_p9), %s833_s27, 512, %s843_s29, %s132_s3, %s746_s26, %s747_s28, %s748_s4  }
  0x2c   : > { %s883_s7 = scalar_lea.hbm %s1000_s1, %s509_s23  ;;  %p1006_p0 = scmp.ge.s32.totalorder %s743_s14, 1 }
  0x2d   : > { %s159_s9 = scalar_lea.vmem [#allocation7], %s494_s24  ;;  %s156_s27 = scalar_lea.sflag [#allocation8], %s824_s22 }
  0x2e   : > { %p887_p4 = pnand %p1006_p0, %p177_p10  ;;  %s169_s17 = sshll.u32 %s159_s9, 4  ;;  %s893_s17 = int_to_ptr.vmem [resolvable:$true] %s169_s17 }
  0x2f   : > { %s629_s29 = scalar_lea.hbm %s883_s7, 512  ;;  %s634_s18 = scalar_lea.hbm %s1000_s1, 2048 }
  0x30   : > { %p630_p5 = scmp.ne.s32.totalorder %s883_s7, %s629_s29  ;;  %p635_p11 = scmp.lt.u32.totalorder %s883_s7, %s1000_s1 }
  0x31   : > { %p636_p13 = scmp.lt.u32.totalorder %s634_s18, %s629_s29  ;;  %p638_p2 = scmp.lt.u32.totalorder %s629_s29, %s883_s7 }
  0x32   : > { %p632_p6 = pnand %p630_p5, %p601_p12 }
  0x33   : > { %p637_p1 = por %p636_p13, %p635_p11 }
  0x34   : > { %p633_p8 = pneg %p632_p6 }
  0x35   : > { %p639_p3 = por %p638_p2, %p637_p1 }
  0x37   : > { %p640_p10 = pnand %p639_p3, %p633_p8 }
  0x39   : > { %643 = shalt.err (!%p640_p10)
}
  0x3a   : > { %s644_s24 = scalar_lea.vmem %s893_s17, 512  ;;  %s749_s5 = smov [#allocation7]  }
  0x3b   : > { %p645_p0 = scmp.ne.s32.totalorder %s893_s17, %s644_s24  ;;  %s649_s6 = sshll.u32 %s749_s5, 4  ;;  %s650_s6 = int_to_ptr.vmem [resolvable:$false] %s649_s6 }
  0x3c   : > { %s651_s9 = scalar_lea.vmem %s650_s6, 1024  ;;  %p652_p7 = scmp.lt.s32.totalorder %s893_s17, %s650_s6 }
  0x3d   : > { %p647_p5 = pnand %p645_p0, %p601_p12  ;;  %p653_p11 = scmp.lt.s32.totalorder %s651_s9, %s644_s24 }
  0x3f   : > { %p648_p6 = pneg %p647_p5  ;;  %p654_p13 = por %p653_p11, %p652_p7 }
  0x41   : > { %p655_p1 = pnand %p654_p13, %p648_p6 }
  0x43   : > { %658 = shalt.err (!%p655_p1)
}
  0x44   : > { %539 = dma.hbm_to_vmem [thread:$0]  (!%p839_p9), %s883_s7, 512, %s893_s17, %s156_s27, %s746_s26, %s747_s28, %s748_s4  }
  0x45   : > { %181 = sbr.rel (%p887_p4) target bundleno = 376 (0x178), region = 28  ;;  %s183_s29 = sand.u32 (!%p887_p4), 1, %s727_s10  }
  0x46   : > { %s501_s23 = sshll.u32 (!%p887_p4), %s183_s29, 5  ;;  %s184_s3 = scalar_lea.sflag (!%p887_p4), [#allocation5], %s183_s29 }
  0x47   : > { %s187_s18 = scalar_lea.vmem (!%p887_p4), [#allocation4], %s501_s23  ;;  %p1008_p7 = scmp.ne.s32.totalorder (!%p887_p4), %s1004_s20, 0 }
  0x4c   : > { %710 = dma.done.wait (%p1008_p7), %s184_s3, 512  }
  0x4d   : > { %712 = vsyncadd (%p1008_p7), %s184_s3, 4294966784  ;;  %s193_s30 = scalar_lea.sflag [#allocation8], %s183_s29  ;;  %s931_s22 = scalar_lea.vmem [#allocation7], %s501_s23 }
  0x4e   : > { %714 = dma.done.wait (%p1008_p7), %s193_s30, 512  }
  0x4f   : > { %716 = vsyncadd (%p1008_p7), %s193_s30, 4294966784  ;;  %p503_p9 = scmp.ne.s32.totalorder %s735_s12, 0 }
  0x50   : > { %vm225_vm0 = vcmask (!%p503_p9), 326656   ;;  %v750_v0 = vmov (!%p503_p9), 0.0   ;;  %v751_v1 = vmov (!%p503_p9), 1.0  }
  0x51   : > { %224 = sbr.rel (%p503_p9) target bundleno = 88 (0x58), region = 40  ;;  %233 = vst [vmem:[#allocation2 + $0x10] sm:$0xff] (!%p503_p9), %v750_v0  ;;  %234 = vst [vmem:[#allocation2 + $0x18] sm:$0xff] (!%p503_p9), %v750_v0 }
  0x52   : > { %237 = vst [vmem:[#allocation2 + $0x30] sm:$0xff] (!%p503_p9), %v750_v0  ;;  %238 = vst [vmem:[#allocation2 + $0x38] sm:$0xff] (!%p503_p9), %v750_v0 }
  0x53   : > { %226 = vst.msk [vmem:[#allocation3] sm:$0xff] (!%p503_p9), %vm225_vm0, %v750_v0  ;;  %227 = vst.msk [vmem:[#allocation3 + $0x8] sm:$0xff] (!%p503_p9), %vm225_vm0, %v750_v0 }
  0x54   : > { %228 = vst.msk [vmem:[#allocation3 + $0x10] sm:$0xff] (!%p503_p9), %vm225_vm0, %v750_v0  ;;  %229 = vst.msk [vmem:[#allocation3 + $0x18] sm:$0xff] (!%p503_p9), %vm225_vm0, %v750_v0 }
  0x55   : > { %230 = vst.msk [vmem:[#allocation3 + $0x20] sm:$0xff] (!%p503_p9), %vm225_vm0, %v750_v0  ;;  %241 = vst [vmem:[#allocation2 + $0x40] sm:$0xff] (!%p503_p9), %v751_v1 }
  0x56   : > { %242 = vst [vmem:[#allocation2 + $0x48] sm:$0xff] (!%p503_p9), %v751_v1 }
  0x58 PF: > { %v244_v2 = vld [vmem:[%s187_s18 + $0x8] sm:$0xff]  ;;  %v246_v3 = vld [vmem:[%s187_s18 + $0x18] sm:$0xf]  ;;  %v243_v4 = vld [vmem:[%s187_s18] sm:$0xff]  ;;  %vm369_vm1 = vcmask 326656   ;;  %p504_p12 = scmp.ne.s32.totalorder %s735_s12, 3 }
  0x59   : > { %250 = vst [vmem:[#allocation2 + $0x18] sm:$0xf] %v246_v3  ;;  %v245_v5 = vld [vmem:[%s187_s18 + $0x10] sm:$0xf]  ;;  %v252_v6 = vld [vmem:[%s931_s22 + $0x8] sm:$0xff]  ;;  %338 = vmatprep.mubr.f32.mxu0 %v244_v2  ;;  %v251_v8 = vld [vmem:[%s931_s22] sm:$0xff] }
  0x5a   : > { %v254_v7 = vld [vmem:[%s931_s22 + $0x18] sm:$0xf]  ;;  %249 = vst [vmem:[#allocation2 + $0x10] sm:$0xf] %v245_v5  ;;  %v253_v9 = vld [vmem:[%s931_s22 + $0x10] sm:$0xf] }
  0x5b   : > { %258 = vst [vmem:[#allocation2 + $0x38] sm:$0xf] %v254_v7  ;;  %257 = vst [vmem:[#allocation2 + $0x30] sm:$0xf] %v253_v9  ;;  %v269_v20 = vld [vmem:[#allocation3] sm:$0xff]  ;;  %v272_v21 = vld [vmem:[#allocation3 + $0x18] sm:$0xff] }
  0x5c   : > { %v267_v19 = vld [vmem:[#allocation2 + $0x40] sm:$0xff]  ;;  %v270_v28 = vld [vmem:[#allocation3 + $0x8] sm:$0xff]  ;;  %v273_v29 = vld [vmem:[#allocation3 + $0x20] sm:$0xff] }
  0x5d   : > { %v268_v18 = vld [vmem:[#allocation2 + $0x48] sm:$0xff]  ;;  %v271_v36 = vld [vmem:[#allocation3 + $0x10] sm:$0xff] }
  0x60   : > { %v262_v10 = vld [vmem:[#allocation2 + $0x18] sm:$0xff] }
  0x61   : > { %v511_v11 = vpack.c.bf16 %v262_v10, %v244_v2  ;;  %v261_v12 = vld [vmem:[#allocation2 + $0x10] sm:$0xff] }
  0x62   : > { %v266_v13 = vld [vmem:[#allocation2 + $0x38] sm:$0xff]  ;;  %v513_v14 = vpack.c.bf16 %v261_v12, %v243_v4  ;;  %v265_v16 = vld [vmem:[#allocation2 + $0x30] sm:$0xff] }
  0x63   : > { %v515_v15 = vpack.c.bf16 %v266_v13, %v252_v6  ;;  %353 = vmatprep.mubr.f32.mxu1 %v266_v13  ;;  %512 = vmatprep.subr.bf16.mxu0 %v511_v11  ;;  %v517_v17 = vpack.c.bf16 %v265_v16, %v251_v8 }
  0x64   : > { %519 = vmatprep.subr.bf16.mxu1 %v511_v11  ;;  %514 = vmatpush1.bf16.xpose.msra.mxu0 %v513_v14 }
  0x65   : > { %522 = vmatpush1.bf16.xpose.msra.mxu1 %v513_v14  ;;  %516 = vmatprep.subr.bf16.mxu0 %v515_v15 }
  0x66   : > { %520 = vmatprep.subr.bf16.mxu1 %v515_v15 }
  0x6c   : > { %518 = vmatpush1.bf16.xpose.msra.mxu0 %v517_v17 }
  0x6d   : > { %523 = vmatpush1.bf16.xpose.msra.mxu1 %v517_v17  ;;  %282 = vmatprep.subr.mxu0 %v268_v18 }
  0x6e   : > { %521 = vmatprep.subr.mxu1 %v268_v18 }
  0x74   : > { %283 = vmatpush1.xpose.msra.mxu0 %v267_v19 }
  0x75   : > { %524 = vmatpush1.xpose.msra.mxu1 %v267_v19 }
  0x77   : > { %339 = vmatmul.mubr.f32.vlgmr.msra.gmra.mrb[0].mxu0 %v243_v4 }
  0x78   : > { %354 = vmatmul.mubr.f32.vlgmr.msra.gmra.mrb[0].mxu1 %v265_v16  ;;  %343 = vmatprep.mubr.f32.mxu0 %v262_v10 }
  0x79   : > { %358 = vmatprep.mubr.f32.mxu1 %v268_v18 }
  0x7b   : > { %344 = vmatmul.mubr.f32.gmra.mrb[2].mxu0 %v261_v12 }
  0x7c   : > { %359 = vmatmul.mubr.f32.gmra.mrb[2].mxu1 %v267_v19  ;;  %348 = vmatprep.mubr.f32.mxu0 %v252_v6 }
  0x7f   : > { %349 = vmatmul.mubr.f32.gmra.mrb[4].mxu0 %v251_v8 }
 0x14a   : > { %v340_v22 = vpop.f32.mrb[0].mxu0 }
 0x14b   : > { %v355_v23 = vpop.f32.mrb[0].mxu1  ;;  %v364_v24 = vadd.f32 %v340_v22, %v269_v20  ;;  %v342_v25 = vpop.f32.mrb[1].mxu0 }
 0x14c   : > { %v367_v26 = vadd.f32 %v355_v23, %v272_v21  ;;  %v357_v27 = vpop.f32.mrb[1].mxu1 }
 0x14d   : > { %370 = vst.msk [vmem:[#allocation3] sm:$0xff] %vm369_vm1, %v364_v24 }
 0x14e   : > { %373 = vst.msk [vmem:[#allocation3 + $0x18] sm:$0xff] %vm369_vm1, %v367_v26  ;;  %v345_v30 = vpop.f32.mrb[2].mxu0 }
 0x14f   : > { %v360_v31 = vpop.f32.mrb[2].mxu1  ;;  %v365_v32 = vadd.f32 %v345_v30, %v270_v28  ;;  %v347_v33 = vpop.f32.mrb[3].mxu0  ;;  %378 = sbr.rel (%p504_p12) target bundleno = 350 (0x15e), region = 44 }
 0x150   : > { %v368_v34 = vadd.f32 %v360_v31, %v273_v29  ;;  %v362_v35 = vpop.f32.mrb[3].mxu1 }
 0x151   : > { %371 = vst.msk [vmem:[#allocation3 + $0x8] sm:$0xff] %vm369_vm1, %v365_v32 }
 0x152   : > { %374 = vst.msk [vmem:[#allocation3 + $0x20] sm:$0xff] %vm369_vm1, %v368_v34  ;;  %v350_v37 = vpop.f32.mrb[4].mxu0 }
 0x153   : > { %v366_v38 = vadd.f32 %v350_v37, %v271_v36  ;;  %v352_v39 = vpop.f32.mrb[5].mxu0 }
 0x154   : > { %v379_v40 = vld [vmem:[#allocation3] sm:$0xff] (!%p504_p12) }
 0x155   : > { %372 = vst.msk [vmem:[#allocation3 + $0x10] sm:$0xff] %vm369_vm1, %v366_v38  ;;  %384 = vst.msk [vmem:[#allocation9] sm:$0xff] (!%p504_p12), %vm369_vm1, %v379_v40  ;;  %v382_v43 = vld [vmem:[#allocation3 + $0x18] sm:$0xff] (!%p504_p12) }
 0x156   : > { %387 = vst.msk [vmem:[#allocation9 + $0x18] sm:$0xff] %vm369_vm1, %v382_v43 }
 0x158   : > { %v380_v41 = vld [vmem:[#allocation3 + $0x8] sm:$0xff] }
 0x159   : > { %385 = vst.msk [vmem:[#allocation9 + $0x8] sm:$0xff] %vm369_vm1, %v380_v41  ;;  %v383_v44 = vld [vmem:[#allocation3 + $0x20] sm:$0xff] }
 0x15a   : > { %388 = vst.msk [vmem:[#allocation9 + $0x20] sm:$0xff] %vm369_vm1, %v383_v44 }
 0x15c   : > { %v381_v42 = vld [vmem:[#allocation3 + $0x10] sm:$0xff] }
 0x15d   : > { %386 = vst.msk [vmem:[#allocation9 + $0x10] sm:$0xff] %vm369_vm1, %v381_v42 }
 0x15e PF: > { %p955_p4 = scmp.eq.s32.totalorder %s491_s15, 3  ;;  %s752_s20 = smov [#allocation9]  }
 0x15f   : > { %s398_s26 = sshll.u32 %s752_s20, 4  ;;  %s399_s26 = int_to_ptr.vmem [resolvable:$true] %s398_s26 }
 0x160   : > { %s659_s28 = scalar_lea.vmem %s399_s26, 640  ;;  %p666_p10 = scmp.lt.s32.totalorder %s399_s26, %s399_s26 }
 0x161   : > { %p660_p8 = scmp.ne.s32.totalorder %s399_s26, %s659_s28  ;;  %p667_p0 = scmp.lt.s32.totalorder %s659_s28, %s659_s28 }
 0x163   : > { %p661_p2 = pnand %p660_p8, %p955_p4  ;;  %p668_p5 = por %p667_p0, %p666_p10 }
 0x165   : > { %p662_p3 = pneg %p661_p2 }
 0x167   : > { %p669_p6 = pnand %p668_p5, %p662_p3 }
 0x169   : > { %672 = shalt.err (!%p669_p6)
}
 0x16a   : > { %s673_s15 = scalar_lea.hbm %s1001_s2, 640 }
 0x16b   : > { %p674_p11 = scmp.ne.s32.totalorder %s1001_s2, %s673_s15  ;;  %p679_p7 = scmp.lt.u32.totalorder %s673_s15, %s1001_s2 }
 0x16d   : > { %p675_p13 = pnand %p674_p11, %p955_p4 }
 0x16f   : > { %p676_p1 = pneg %p675_p13 }
 0x171   : > { %p681_p9 = pnand %p679_p7, %p676_p1 }
 0x173   : > { %684 = shalt.err (!%p681_p9)
}
 0x174   : > { %s753_s25 = smov 128   ;;  %s754_s24 = smov 8  }
 0x175   : > { %530 = dma.vmem_to_hbm [thread:$0]  (%p955_p4), %s399_s26, 640, %s1001_s2, [#allocation6], %s753_s25, %s753_s25, %s754_s24  }
 0x176   : > { %718 = dma.done.wait (%p955_p4), [#allocation6], 640  }
 0x177   : > { %720 = vsyncadd (%p955_p4), [#allocation6], 4294966656 }
 0x178 PF: > { %s19_s14 = sadd.s32 1, %s743_s14   ;;  %s1010_s9 = smov %s727_s10 }
 0x179   : > { %p16_p12 = scmp.ge.s32.totalorder %s19_s14, 6   ;;  %s1011_s10 = smov %s731_s11 }
 0x17a   : > { %s1012_s11 = smov %s821_s21  ;;  %s1013_s12 = smov %s739_s13 }
 0x17b   : > { %s1014_s13 = smov %s1016_s16  ;;  %18 = sbr.rel (!%p16_p12) target bundleno = 7 (0x7), region = 87 }
 0x182   :  { %414 = vsyncpa [#allocation5], 1 }
 0x183   :  { %416 = vsyncpa [#allocation5 + $0x1], 1 }
 0x184   :  { %417 = vsyncpa [#allocation8], 1 }
 0x185   :  { %419 = vsyncpa [#allocation8 + $0x1], 1 }
 0x186   :  { %420 = vsyncpa [#allocation6], 1 }
 0x187   :  { %422 = vsyncpa [#allocation6 + $0x1], 1 }

</bundles_post_ra>
